<compile_context>
chip_gen: v5e
topology: v5e:2x2
jax: 0.10.0
libtpu: 0.0.40
codegen_flags: <defaults>
</compile_context>

<pallas_src>
import functools

import jax
import jax.numpy as jnp
from jax.experimental import pallas as pl
from jax.experimental.pallas import tpu as pltpu


def _round_up(x, m):
    return (x + m - 1) // m * m


# ---------------------------------------------------------------------------------
# Pass 1: lane-dense packed transposed-conv matmul + BN partial statistics.
# ---------------------------------------------------------------------------------
def _taps_stats_kernel(x_ref, w_ref, eo_ref, sum_ref, sq_ref):
    @pl.when(pl.program_id(1) == 0)
    def _():
        sum_ref[...] = jnp.zeros_like(sum_ref)
        sq_ref[...] = jnp.zeros_like(sq_ref)

    # One lane-dense MXU matmul per tile: [tmg, Kp] @ [Kp, Np], f32 accumulation.
    eo = jnp.dot(x_ref[...], w_ref[...], preferred_element_type=jnp.float32)
    eo_ref[...] = eo.astype(eo_ref.dtype)

    # Per-sublane partial sums: reshape splits the row axis on an 8-row (vreg)
    # boundary, so the reduction over axis 0 is pure VPU vreg adds (MXU/XLU stay
    # free); the final 8-row reduce happens once in the wrapper.
    tmg, npk = eo.shape
    r = eo.reshape(tmg // 8, 8, npk)
    sum_ref[...] += jnp.sum(r, axis=0)
    sq_ref[...] += jnp.sum(r * r, axis=0)


# ---------------------------------------------------------------------------------
# Pass 2: pure elementwise BatchNorm scale/shift + ELU on the stored taps.
# ---------------------------------------------------------------------------------
def _bn_elu_kernel(eo_ref, ss_ref, o_ref):
    y = eo_ref[...].astype(jnp.float32) * ss_ref[0:1, :] + ss_ref[1:2, :]
    o_ref[...] = jnp.where(y > 0, y, jnp.exp(y) - 1.0).astype(o_ref.dtype)  # ELU(a=1)


def causal_trans_conv_block(x_nchw, w, bias, gamma, beta, eps=1e-5, out_dtype=None,
                            stream_dtype=jnp.bfloat16, tile_folded_rows=1024,
                            channels_last_output=False):
    """Forward pass of CausalTransConvBlock (is_last=False -> ELU).

    x_nchw: [B, Cin, F, T]   (PyTorch NCHW)
    w     : [Cin, Cout, 3, 2] (PyTorch ConvTranspose2d weight layout)
    bias  : [Cout]  (unused in-kernel: cancelled by train-mode BatchNorm)
    gamma, beta: [Cout]
    returns [B, Cout, 2F+1, T]  (or [B, 2F+1, T, Cout] if channels_last_output)
    """
    del bias  # exactly cancelled by the training-mode BatchNorm mean subtraction
    B, Cin, F, T = x_nchw.shape
    Cout = w.shape[1]
    P = F + 1                      # packed frequency rows (even/odd pair per row)
    M = B * P * T                  # packed (b, f_half, t) rows
    out_dtype = x_nchw.dtype if out_dtype is None else out_dtype

    # ---- lane-dense packing factors -------------------------------------------
    k_unit = 4 * Cin               # per-position packed input taps
    n_unit = 2 * Cout              # per-position packed outputs [even | odd]
    if k_unit % 128 == 0:
        g = 1                      # already lane-dense
    elif 128 % k_unit == 0:
        g = 128 // k_unit          # fold g consecutive positions into lanes (K=128)
    else:
        g = 1                      # TODO(synk): pad Cin to a 128-divisor; this
                                   # fallback is correct but lane-sparse.
    Kp, Np = g * k_unit, g * n_unit
    Mg = -(-M // g)

    # ---- tile size from the real (lane-dense) VMEM footprint -------------------
    in_b = jnp.dtype(stream_dtype).itemsize
    eo_b = jnp.dtype(stream_dtype).itemsize
    out_b = jnp.dtype(out_dtype).itemsize
    budget = 12 * 1024 * 1024                       # double-buffered working set
    per_row = 2 * max(Kp * in_b + Np * eo_b,        # pass 1: x in + eo out
                      Np * eo_b + Np * out_b)       # pass 2: eo in + y out
    fixed = 2 * Kp * Np * in_b + 64 * 1024          # resident weight + stats slack
    tmg = min(tile_folded_rows, max(8, (budget - fixed) // per_row))
    tmg = max(8, min(_round_up(Mg, 8), (tmg // 8) * 8))
    n_split = 2                                     # v7x megacore split of pass 1
    n_tiles = _round_up(-(-Mg // tmg), n_split)
    ntpc = n_tiles // n_split
    Mg_pad = n_tiles * tmg
    m_pad = Mg_pad * g
    vmem_limit = 24 * 1024 * 1024                   # <= half of v7x's 64 MiB per core

    # ---- packed / block-diagonal weight ----------------------------------------
    # rows: [x[p,t] | x[p-1,t] | x[p,t-1] | x[p-1,t-1]], cols: [even | odd]
    zcc = jnp.zeros((Cin, Cout), w.dtype)
    w4 = jnp.concatenate([
        jnp.concatenate([w[:, :, 0, 0], w[:, :, 1, 0]], axis=1),
        jnp.concatenate([w[:, :, 2, 0], zcc], axis=1),
        jnp.concatenate([w[:, :, 0, 1], w[:, :, 1, 1]], axis=1),
        jnp.concatenate([w[:, :, 2, 1], zcc], axis=1),
    ], axis=0)                                                     # [4Cin, 2Cout]
    if g > 1:
        wbd = (jnp.eye(g, dtype=w4.dtype)[:, None, :, None]
               * w4[None, :, None, :]).reshape(Kp, Np)             # block diagonal
    else:
        wbd = w4
    wbd = wbd.astype(stream_dtype)

    # ---- wrapper layout glue: pack the 4 shifted taps per row, fold into lanes --
    # TODO(synk): this is one extra HBM pass over the activation (matters most on
    # v5e); it could be folded into the kernel with f/t-offset index_maps on xt.
    xt = jnp.transpose(x_nchw, (0, 2, 3, 1))                       # [B, F, T, Cin]
    zf = jnp.zeros((B, 1, T, Cin), xt.dtype)
    x_cur = jnp.concatenate([xt, zf], axis=1)                      # x[p,   t], p=0..F
    x_prv = jnp.concatenate([zf, xt], axis=1)                      # x[p-1, t]
    zt = jnp.zeros((B, P, 1, Cin), xt.dtype)
    x_cur_d = jnp.concatenate([zt, x_cur[:, :, :-1]], axis=2)      # x[p,   t-1] causal
    x_prv_d = jnp.concatenate([zt, x_prv[:, :, :-1]], axis=2)      # x[p-1, t-1]
    x4 = jnp.concatenate([x_cur, x_prv, x_cur_d, x_prv_d], axis=-1)
    x4 = x4.reshape(M, k_unit).astype(stream_dtype)
    if m_pad > M:                                                  # zero rows: stats-neutral
        x4 = jnp.concatenate([x4, jnp.zeros((m_pad - M, k_unit), x4.dtype)], axis=0)
    xp = x4.reshape(Mg_pad, Kp)                                    # pure reinterpretation

    # ---- pass 1: packed taps -> HBM, per-channel partial sums (BN training stats)
    x_spec = pl.BlockSpec((tmg, Kp), lambda c, i: (c * ntpc + i, 0))
    w_spec = pl.BlockSpec((Kp, Np), lambda c, i: (0, 0))
    eo_spec = pl.BlockSpec((tmg, Np), lambda c, i: (c * ntpc + i, 0))
    st_spec = pl.BlockSpec((8, Np), lambda c, i: (c, 0))           # per-core resident

    eo, sum_p, sq_p = pl.pallas_call(
        _taps_stats_kernel,
        grid=(n_split, ntpc),
        in_specs=[x_spec, w_spec],
        out_specs=(eo_spec, st_spec, st_spec),
        out_shape=(jax.ShapeDtypeStruct((Mg_pad, Np), stream_dtype),
                   jax.ShapeDtypeStruct((n_split * 8, Np), jnp.float32),
                   jax.ShapeDtypeStruct((n_split * 8, Np), jnp.float32)),
        compiler_params=pltpu.CompilerParams(
            dimension_semantics=("parallel", "arbitrary"),
            vmem_limit_bytes=vmem_limit),
    )(xp, wbd)

    # ---- tiny [Cout]-vector BN math between the passes --------------------------
    # Padded rows and the odd-half outputs at p==F are exactly zero (zero weight
    # blocks, no bias), so only the static valid count matters.
    # TODO(synk): E[x^2]-mean^2 in f32 can lose precision for large-mean activations;
    # the (2 cores x 8 sublanes x g lane-blocks) partial accumulators mitigate but a
    # centered second stats pass would be exact at extreme scales.
    n_valid = jnp.asarray(B * (2 * F + 1) * T, jnp.float32)
    ch_sum = sum_p.sum(axis=0).reshape(g, 2, Cout).sum(axis=(0, 1))
    ch_sq = sq_p.sum(axis=0).reshape(g, 2, Cout).sum(axis=(0, 1))
    mean = ch_sum / n_valid
    var = ch_sq / n_valid - mean * mean                  # biased (BN training mode)
    inv_std = jax.lax.rsqrt(var + eps)
    scale = gamma.astype(jnp.float32) * inv_std
    shift = beta.astype(jnp.float32) - mean * scale
    ss = jnp.stack([jnp.tile(scale, 2 * g), jnp.tile(shift, 2 * g)], axis=0)  # [2, Np]

    # ---- pass 2: pure scale/shift + ELU over the stored taps (lane-dense stores) -
    y = pl.pallas_call(
        _bn_elu_kernel,
        grid=(n_tiles,),
        in_specs=[pl.BlockSpec((tmg, Np), lambda i: (i, 0)),
                  pl.BlockSpec((2, Np), lambda i: (0, 0))],
        out_specs=pl.BlockSpec((tmg, Np), lambda i: (i, 0)),
        out_shape=jax.ShapeDtypeStruct((Mg_pad, Np), out_dtype),
        compiler_params=pltpu.CompilerParams(
            dimension_semantics=("parallel",),
            vmem_limit_bytes=vmem_limit),
    )(eo, ss)

    # ---- wrapper layout glue: unfold lanes, interleave even/odd rows, to NCHW ----
    y = y.reshape(Mg_pad * g, n_unit)[:M].reshape(B, P, T, n_unit)
    ev = y[..., :Cout]                                   # rows fo = 0, 2, ..., 2F
    od = y[:, :F, :, Cout:]                              # rows fo = 1, 3, ..., 2F-1
    inter = jnp.stack([ev[:, :F], od], axis=2).reshape(B, 2 * F, T, Cout)
    out = jnp.concatenate([inter, ev[:, F:]], axis=1)    # [B, 2F+1, T, Cout]
    if channels_last_output:                             # v5e: skip the NCHW transpose
        return out.astype(out_dtype)
    return jnp.transpose(out, (0, 3, 1, 2)).astype(out_dtype)   # [B, Cout, 2F+1, T]


def ref_forward(x, w, bias, gamma, beta, eps=1e-5):
    """Pure-JAX f32 reference mirroring the PyTorch module (training-mode BN)."""
    B, Cin, F, T = x.shape
    Cout = w.shape[1]
    y = jnp.zeros((B, Cout, 2 * F + 1, T + 1), jnp.float32)
    for kh in range(3):
        for kw in range(2):
            contrib = jnp.einsum('bift,io->boft', x, w[:, :, kh, kw])
            y = y.at[:, :, kh:kh + 2 * F:2, kw:kw + T].add(contrib)
    y = y + bias.reshape(1, -1, 1, 1)
    y = y[:, :, :, :-1]
    mean = y.mean(axis=(0, 2, 3), keepdims=True)
    var = y.var(axis=(0, 2, 3), keepdims=True)           # biased, as in BN training
    yh = (y - mean) / jnp.sqrt(var + eps)
    yh = yh * gamma.reshape(1, -1, 1, 1) + beta.reshape(1, -1, 1, 1)
    return jnp.where(yh > 0, yh, jnp.exp(yh) - 1.0)


if __name__ == "__main__":
    B, Cin, Cout, F, T = 2, 4, 8, 16, 8
    key = jax.random.PRNGKey(0)
    kx, kw, kb = jax.random.split(key, 3)
    x = jax.random.normal(kx, (B, Cin, F, T), jnp.float32)
    w = jax.random.normal(kw, (Cin, Cout, 3, 2), jnp.float32) * 0.2
    bias = jax.random.normal(kb, (Cout,), jnp.float32) * 0.1
    gamma = jnp.ones((Cout,), jnp.float32)     # PyTorch BatchNorm2d default init
    beta = jnp.zeros((Cout,), jnp.float32)

    ref = ref_forward(x, w, bias, gamma, beta)

    # Exact-path check: f32 streams, tight tolerance.
    fwd_f32 = jax.jit(functools.partial(causal_trans_conv_block,
                                        stream_dtype=jnp.float32))
    out_f32 = jax.block_until_ready(fwd_f32(x, w, bias, gamma, beta))
    assert out_f32.shape == (B, Cout, 2 * F + 1, T), out_f32.shape
    err_f32 = float(jnp.max(jnp.abs(out_f32 - ref)))
    assert err_f32 < 2e-3, f"f32-stream mismatch vs reference: {err_f32}"

    # Default perf path: bf16 streams.  BN normalization amplifies the bf16
    # quantization of inputs / packed taps, hence the looser tolerance.
    fwd = jax.jit(causal_trans_conv_block)
    out = jax.block_until_ready(fwd(x, w, bias, gamma, beta))
    assert out.shape == (B, Cout, 2 * F + 1, T), out.shape
    err_bf16 = float(jnp.max(jnp.abs(out - ref)))
    assert err_bf16 < 1e-1, f"bf16-stream mismatch vs reference: {err_bf16}"

    print("KERNEL_OK")
</pallas_src>

<mosaic_0001>
module attributes {stable_mosaic.version = 11 : i64} {
  func.func @_taps_stats_kernel(%arg0: i32, %arg1: i32, %arg2: memref<40x128xf32, #tpu.memory_space<vmem>>, %arg3: memref<128x128xf32, #tpu.memory_space<vmem>>, %arg4: memref<40x128xf32, #tpu.memory_space<vmem>>, %arg5: memref<8x128xf32, #tpu.memory_space<vmem>>, %arg6: memref<8x128xf32, #tpu.memory_space<vmem>>) attributes {dimension_semantics = [#tpu.dimension_semantics<parallel>, #tpu.dimension_semantics<arbitrary>], iteration_bounds = array<i64: 2, 1>, scalar_prefetch = 0 : i64, scratch_operands = 0 : i64, tpu.core_type = #tpu.core_type<tc>, window_params = [{transform_indices = @transform_0, window_bounds = array<i64: 40, 128>}, {pipeline_mode = #tpu.pipeline_mode<synchronous>, transform_indices = @transform_1, window_bounds = array<i64: 128, 128>}, {transform_indices = @transform_2, window_bounds = array<i64: 40, 128>}, {transform_indices = @transform_3, window_bounds = array<i64: 8, 128>}, {transform_indices = @transform_4, window_bounds = array<i64: 8, 128>}]} {
    %c0_i32 = arith.constant 0 : i32
    %0 = arith.cmpi eq, %arg1, %c0_i32 : i32
    %1 = arith.extui %0 : i1 to i32
    %c0_i32_0 = arith.constant 0 : i32
    %2 = arith.cmpi ne, %1, %c0_i32_0 : i32
    scf.if %2 {
      %cst_16 = arith.constant 0.000000e+00 : f32
      %17 = vector.broadcast %cst_16 : f32 to vector<8x128xf32>
      %c0_17 = arith.constant 0 : index
      %c0_18 = arith.constant 0 : index
      %18 = vector.load %arg5[%c0_17, %c0_18] : memref<8x128xf32, #tpu.memory_space<vmem>>, vector<8x128xf32>
      tpu.vector_store %arg5[%c0_17, %c0_18], %17 {strides = array<i32>} : memref<8x128xf32, #tpu.memory_space<vmem>>, vector<8x128xf32>,
      %cst_19 = arith.constant 0.000000e+00 : f32
      %19 = vector.broadcast %cst_19 : f32 to vector<8x128xf32>
      %c0_20 = arith.constant 0 : index
      %c0_21 = arith.constant 0 : index
      %20 = vector.load %arg6[%c0_20, %c0_21] : memref<8x128xf32, #tpu.memory_space<vmem>>, vector<8x128xf32>
      tpu.vector_store %arg6[%c0_20, %c0_21], %19 {strides = array<i32>} : memref<8x128xf32, #tpu.memory_space<vmem>>, vector<8x128xf32>,
    } else {
    }
    %c0 = arith.constant 0 : index
    %c0_1 = arith.constant 0 : index
    %3 = vector.load %arg2[%c0, %c0_1] : memref<40x128xf32, #tpu.memory_space<vmem>>, vector<40x128xf32>
    %c0_2 = arith.constant 0 : index
    %c0_3 = arith.constant 0 : index
    %4 = vector.load %arg3[%c0_2, %c0_3] : memref<128x128xf32, #tpu.memory_space<vmem>>, vector<128x128xf32>
    %cst = arith.constant dense<0.000000e+00> : vector<40x128xf32>
    %5 = tpu.matmul %3, %4, %cst {dimension_numbers = #tpu.dot_dimension_numbers<[1], [0], [0], [1], [0, 0, 1, 1], [], []>} : vector<40x128xf32>, vector<128x128xf32>, vector<40x128xf32> -> vector<40x128xf32>
    %c0_4 = arith.constant 0 : index
    %c0_5 = arith.constant 0 : index
    %6 = vector.load %arg4[%c0_4, %c0_5] : memref<40x128xf32, #tpu.memory_space<vmem>>, vector<40x128xf32>
    tpu.vector_store %arg4[%c0_4, %c0_5], %5 {strides = array<i32>} : memref<40x128xf32, #tpu.memory_space<vmem>>, vector<40x128xf32>,
    %7 = vector.shape_cast %5 : vector<40x128xf32> to vector<5x8x128xf32>
    %c0_6 = arith.constant 0 : index
    %c0_7 = arith.constant 0 : index
    %8 = vector.load %arg5[%c0_6, %c0_7] : memref<8x128xf32, #tpu.memory_space<vmem>>, vector<8x128xf32>
    %cst_8 = arith.constant dense<0.000000e+00> : vector<8x128xf32>
    %9 = vector.multi_reduction <add>, %7, %cst_8 [0] : vector<5x8x128xf32> to vector<8x128xf32>
    %10 = arith.addf %8, %9 : vector<8x128xf32>
    %c0_9 = arith.constant 0 : index
    %c0_10 = arith.constant 0 : index
    %11 = vector.load %arg5[%c0_9, %c0_10] : memref<8x128xf32, #tpu.memory_space<vmem>>, vector<8x128xf32>
    tpu.vector_store %arg5[%c0_9, %c0_10], %10 {strides = array<i32>} : memref<8x128xf32, #tpu.memory_space<vmem>>, vector<8x128xf32>,
    %c0_11 = arith.constant 0 : index
    %c0_12 = arith.constant 0 : index
    %12 = vector.load %arg6[%c0_11, %c0_12] : memref<8x128xf32, #tpu.memory_space<vmem>>, vector<8x128xf32>
    %13 = arith.mulf %7, %7 : vector<5x8x128xf32>
    %cst_13 = arith.constant dense<0.000000e+00> : vector<8x128xf32>
    %14 = vector.multi_reduction <add>, %13, %cst_13 [0] : vector<5x8x128xf32> to vector<8x128xf32>
    %15 = arith.addf %12, %14 : vector<8x128xf32>
    %c0_14 = arith.constant 0 : index
    %c0_15 = arith.constant 0 : index
    %16 = vector.load %arg6[%c0_14, %c0_15] : memref<8x128xf32, #tpu.memory_space<vmem>>, vector<8x128xf32>
    tpu.vector_store %arg6[%c0_14, %c0_15], %15 {strides = array<i32>} : memref<8x128xf32, #tpu.memory_space<vmem>>, vector<8x128xf32>,
    return
  }
  func.func @transform_0(%arg0: i32, %arg1: i32) -> (i32, i32) {
    %c1_i32 = arith.constant 1 : i32
    %0 = arith.muli %arg0, %c1_i32 : i32
    %1 = arith.addi %0, %arg1 : i32
    %c0_i32 = arith.constant 0 : i32
    %c0_i32_0 = arith.constant 0 : i32
    return %1, %c0_i32 : i32, i32
  }
  func.func @transform_1(%arg0: i32, %arg1: i32) -> (i32, i32) {
    %c0_i32 = arith.constant 0 : i32
    %c0_i32_0 = arith.constant 0 : i32
    %c0_i32_1 = arith.constant 0 : i32
    return %c0_i32, %c0_i32_0 : i32, i32
  }
  func.func @transform_2(%arg0: i32, %arg1: i32) -> (i32, i32) {
    %c1_i32 = arith.constant 1 : i32
    %0 = arith.muli %arg0, %c1_i32 : i32
    %1 = arith.addi %0, %arg1 : i32
    %c0_i32 = arith.constant 0 : i32
    %c0_i32_0 = arith.constant 0 : i32
    return %1, %c0_i32 : i32, i32
  }
  func.func @transform_3(%arg0: i32, %arg1: i32) -> (i32, i32) {
    %c0_i32 = arith.constant 0 : i32
    %c0_i32_0 = arith.constant 0 : i32
    return %arg0, %c0_i32 : i32, i32
  }
  func.func @transform_4(%arg0: i32, %arg1: i32) -> (i32, i32) {
    %c0_i32 = arith.constant 0 : i32
    %c0_i32_0 = arith.constant 0 : i32
    return %arg0, %c0_i32 : i32, i32
  }
}

module attributes {stable_mosaic.version = 11 : i64} {
  func.func @_bn_elu_kernel(%arg0: i32, %arg1: memref<40x128xf32, #tpu.memory_space<vmem>>, %arg2: memref<2x128xf32, #tpu.memory_space<vmem>>, %arg3: memref<40x128xf32, #tpu.memory_space<vmem>>) attributes {dimension_semantics = [#tpu.dimension_semantics<parallel>], iteration_bounds = array<i64: 2>, scalar_prefetch = 0 : i64, scratch_operands = 0 : i64, tpu.core_type = #tpu.core_type<tc>, window_params = [{transform_indices = @transform_0, window_bounds = array<i64: 40, 128>}, {pipeline_mode = #tpu.pipeline_mode<synchronous>, transform_indices = @transform_1, window_bounds = array<i64: 2, 128>}, {transform_indices = @transform_2, window_bounds = array<i64: 40, 128>}]} {
    %c0 = arith.constant 0 : index
    %c0_0 = arith.constant 0 : index
    %0 = vector.load %arg1[%c0, %c0_0] : memref<40x128xf32, #tpu.memory_space<vmem>>, vector<40x128xf32>
    %c0_1 = arith.constant 0 : index
    %c0_2 = arith.constant 0 : index
    %1 = vector.load %arg2[%c0_1, %c0_2] : memref<2x128xf32, #tpu.memory_space<vmem>>, vector<1x128xf32>
    %2 = vector.broadcast %1 : vector<1x128xf32> to vector<40x128xf32>
    %3 = arith.mulf %0, %2 : vector<40x128xf32>
    %c1 = arith.constant 1 : index
    %c0_3 = arith.constant 0 : index
    %4 = vector.load %arg2[%c1, %c0_3] : memref<2x128xf32, #tpu.memory_space<vmem>>, vector<1x128xf32>
    %5 = vector.broadcast %4 : vector<1x128xf32> to vector<40x128xf32>
    %6 = arith.addf %3, %5 : vector<40x128xf32>
    %cst = arith.constant 0.000000e+00 : f32
    %7 = vector.broadcast %cst : f32 to vector<40x128xf32>
    %8 = arith.cmpf ogt, %6, %7 : vector<40x128xf32>
    %9 = math.exp %6 : vector<40x128xf32>
    %cst_4 = arith.constant 1.000000e+00 : f32
    %10 = vector.broadcast %cst_4 : f32 to vector<40x128xf32>
    %11 = arith.subf %9, %10 : vector<40x128xf32>
    %12 = arith.select %8, %6, %11 : vector<40x128xi1>, vector<40x128xf32>
    %c0_5 = arith.constant 0 : index
    %c0_6 = arith.constant 0 : index
    %13 = vector.load %arg3[%c0_5, %c0_6] : memref<40x128xf32, #tpu.memory_space<vmem>>, vector<40x128xf32>
    tpu.vector_store %arg3[%c0_5, %c0_6], %12 {strides = array<i32>} : memref<40x128xf32, #tpu.memory_space<vmem>>, vector<40x128xf32>,
    return
  }
  func.func @transform_0(%arg0: i32) -> (i32, i32) {
    %c0_i32 = arith.constant 0 : i32
    %c0_i32_0 = arith.constant 0 : i32
    return %arg0, %c0_i32 : i32, i32
  }
  func.func @transform_1(%arg0: i32) -> (i32, i32) {
    %c0_i32 = arith.constant 0 : i32
    %c0_i32_0 = arith.constant 0 : i32
    %c0_i32_1 = arith.constant 0 : i32
    return %c0_i32, %c0_i32_0 : i32, i32
  }
  func.func @transform_2(%arg0: i32) -> (i32, i32) {
    %c0_i32 = arith.constant 0 : i32
    %c0_i32_0 = arith.constant 0 : i32
    return %arg0, %c0_i32 : i32, i32
  }
}

</mosaic_0001>

<bundles_post_ra>
// kernel: tile.17
= control target key start
LH: loop header
LB: loop body
LE: loop exit
PB: predicated region body
PF: predicated region fallthrough
CT: control target
= control target key end

     0   :  { %s28_s0 = inlined_call_operand.vmem [shape: f32[8], index: 0, kind: input, shape index: {}]   ;;  %s29_s1 = inlined_call_operand.vmem [shape: f32[16,8], index: 1, kind: output, shape index: {}]  }
   0x1   :  { %v4_v0 = vld [vmem:[%s28_s0] ss:$0 sm:$0xff] }
   0x2   :  { %5 = vst [vmem:[%s29_s1] sm:$0xff] %v4_v0 }
   0x3   :  { %8 = vst [vmem:[%s29_s1 + $0x8] sm:$0xff] %v4_v0 }

// kernel: tile.19
= control target key start
LH: loop header
LB: loop body
LE: loop exit
PB: predicated region body
PF: predicated region fallthrough
CT: control target
= control target key end

     0   :  { %s131_s10 = smov 120   ;;  %s132_s11 = smov 104   ;;  %vm3_vm0 = vcmask 64512   ;;  %vm9_vm1 = vcmask 1048512   ;;  %vm15_vm2 = vcmask 982912   ;;  %vm21_vm3 = vcmask 917312   ;;  %s207_s0 = inlined_call_operand.vmem [shape: f32[16,8], index: 0, kind: input, shape index: {}]   ;;  %s208_s1 = inlined_call_operand.vmem [shape: f32[1,128], index: 1, kind: output, shape index: {}]  }
   0x1   :  { %v101_v0 = vld [vmem:[%s207_s0 + $0xf] sm:$0x1]   ;;  %v103_v1 = vld [vmem:[%s207_s0 + $0xd] sm:$0x1]   ;;  %v105_v2 = vld [vmem:[%s207_s0 + $0xb] sm:$0x1]  }
   0x2   :  { %7 = vrot.lane.b32.xlu0 %v101_v0, %s131_s10  ;;  %19 = vrot.lane.b32.xlu1 %v103_v1, %s132_s11  ;;  %s133_s14 = smov 88   ;;  %v102_v3 = vld [vmem:[%s207_s0 + $0xe] sm:$0x1]   ;;  %v104_v4 = vld [vmem:[%s207_s0 + $0xc] sm:$0x1]   ;;  %s134_s19 = smov 112  }
   0x3   :  { %31 = vrot.lane.b32.xlu2 %v105_v2, %s133_s14  ;;  %s135_s20 = smov 96   ;;  %v106_v5 = vld [vmem:[%s207_s0 + $0xa] sm:$0x1]   ;;  %s136_s23 = smov 80   ;;  %v107_v6 = vld [vmem:[%s207_s0 + $0x9] sm:$0x1]  }
   0x4   :  { %v108_v7 = vld [vmem:[%s207_s0 + $0x8] sm:$0x1]   ;;  %s137_s28 = smov 72   ;;  %s138_s29 = smov 64   ;;  %v109_v8 = vld [vmem:[%s207_s0 + $0x7] sm:$0x1]  }
   0x5   :  { %s139_s3 = smov 56   ;;  %v110_v9 = vld [vmem:[%s207_s0 + $0x6] sm:$0x1]   ;;  %v111_v10 = vld [vmem:[%s207_s0 + $0x5] sm:$0x1]   ;;  %s140_s8 = smov 48  }
   0x6   :  { %s141_s9 = smov 40   ;;  %v112_v11 = vld [vmem:[%s207_s0 + $0x4] sm:$0x1]   ;;  %s142_s12 = smov 32   ;;  %v113_v12 = vld [vmem:[%s207_s0 + $0x3] sm:$0x1]  }
   0x7   :  { %v114_v13 = vld [vmem:[%s207_s0 + $0x2] sm:$0x1]   ;;  %s143_s17 = smov 24   ;;  %s144_s18 = smov 16   ;;  %v115_v14 = vld [vmem:[%s207_s0 + $0x1] sm:$0x1]  }
   0x8   :  { %s145_s21 = smov 8   ;;  %v2_v15 = vld [vmem:[%s207_s0] sm:$0x1]   ;;  %vm27_vm4 = vcmask 851712   ;;  %vm33_vm5 = vcmask 786112   ;;  %vm39_vm6 = vcmask 720512  }
   0x9   :  { %4 = vst.msk [vmem:[#allocation0] sm:$0x1] %vm3_vm0, %v2_v15   ;;  %vm45_vm7 = vcmask 654912   ;;  %vm51_vm8 = vcmask 589312   ;;  %vm57_vm9 = vcmask 523712   ;;  %vm63_vm10 = vcmask 458112  }
   0xa   :  { %13 = vrot.lane.b32.xlu0 %v102_v3, %s134_s19  ;;  %25 = vrot.lane.b32.xlu1 %v104_v4, %s135_s20  ;;  %vm69_vm11 = vcmask 392512   ;;  %vm75_vm12 = vcmask 326912   ;;  %vm81_vm13 = vcmask 261312   ;;  %vm87_vm14 = vcmask 195712  }
   0xb   :  { %37 = vrot.lane.b32.xlu2 %v106_v5, %s136_s23  ;;  %vm93_vm15 = vcmask 130112  }
  0x12   :  { %43 = vrot.lane.b32.xlu0 %v107_v6, %s137_s28  ;;  %49 = vrot.lane.b32.xlu1 %v108_v7, %s138_s29 }
  0x13   :  { %55 = vrot.lane.b32.xlu2 %v109_v8, %s139_s3 }
  0x1a   :  { %61 = vrot.lane.b32.xlu0 %v110_v9, %s140_s8  ;;  %67 = vrot.lane.b32.xlu1 %v111_v10, %s141_s9 }
  0x1b   :  { %73 = vrot.lane.b32.xlu2 %v112_v11, %s142_s12 }
  0x22   :  { %79 = vrot.lane.b32.xlu0 %v113_v12, %s143_s17  ;;  %85 = vrot.lane.b32.xlu1 %v114_v13, %s144_s18 }
  0x23   :  { %91 = vrot.lane.b32.xlu2 %v115_v14, %s145_s21 }
  0x5d   :  { %v32_v16 = vpop.permute.xlu2 %31  }
  0x65   :  { %v38_v17 = vpop.permute.xlu2 %37  }
  0x6d   :  { %v56_v18 = vpop.permute.xlu2 %55  }
  0x74   :  { %v8_v19 = vpop.permute.xlu0 %7   ;;  %v20_v20 = vpop.permute.xlu1 %19  }
  0x75   :  { %10 = vst.msk [vmem:[#allocation0] sm:$0x1] %vm9_vm1, %v8_v19   ;;  %v74_v21 = vpop.permute.xlu2 %73  }
  0x7c   :  { %v14_v22 = vpop.permute.xlu0 %13   ;;  %v26_v23 = vpop.permute.xlu1 %25  }
  0x7d   :  { %16 = vst.msk [vmem:[#allocation0] sm:$0x1] %vm15_vm2, %v14_v22   ;;  %v92_v24 = vpop.permute.xlu2 %91  }
  0x7e   :  { %22 = vst.msk [vmem:[#allocation0] sm:$0x1] %vm21_vm3, %v20_v20  }
  0x7f   :  { %28 = vst.msk [vmem:[#allocation0] sm:$0x1] %vm27_vm4, %v26_v23  }
  0x80   :  { %34 = vst.msk [vmem:[#allocation0] sm:$0x1] %vm33_vm5, %v32_v16  }
  0x81   :  { %40 = vst.msk [vmem:[#allocation0] sm:$0x1] %vm39_vm6, %v38_v17  }
  0x84   :  { %v44_v25 = vpop.permute.xlu0 %43   ;;  %v50_v26 = vpop.permute.xlu1 %49  }
  0x85   :  { %46 = vst.msk [vmem:[#allocation0] sm:$0x1] %vm45_vm7, %v44_v25  }
  0x86   :  { %52 = vst.msk [vmem:[#allocation0] sm:$0x1] %vm51_vm8, %v50_v26  }
  0x87   :  { %58 = vst.msk [vmem:[#allocation0] sm:$0x1] %vm57_vm9, %v56_v18  }
  0x8c   :  { %v62_v27 = vpop.permute.xlu0 %61   ;;  %v68_v28 = vpop.permute.xlu1 %67  }
  0x8d   :  { %64 = vst.msk [vmem:[#allocation0] sm:$0x1] %vm63_vm10, %v62_v27  }
  0x8e   :  { %70 = vst.msk [vmem:[#allocation0] sm:$0x1] %vm69_vm11, %v68_v28  }
  0x8f   :  { %76 = vst.msk [vmem:[#allocation0] sm:$0x1] %vm75_vm12, %v74_v21  }
  0x94   :  { %v80_v29 = vpop.permute.xlu0 %79   ;;  %v86_v30 = vpop.permute.xlu1 %85  }
  0x95   :  { %82 = vst.msk [vmem:[#allocation0] sm:$0x1] %vm81_vm13, %v80_v29  }
  0x96   :  { %88 = vst.msk [vmem:[#allocation0] sm:$0x1] %vm87_vm14, %v86_v30  }
  0x97   :  { %94 = vst.msk [vmem:[#allocation0] sm:$0x1] %vm93_vm15, %v92_v24  }
  0x9e   :  { %v97_v31 = vld [vmem:[#allocation0] sm:$0x1] }
  0x9f   :  { %100 = vst [vmem:[%s208_s1] sm:$0x1] %v97_v31 }

// kernel: causal_trans_conv_block.2
= control target key start
LH: loop header
LB: loop body
LE: loop exit
PB: predicated region body
PF: predicated region fallthrough
CT: control target
= control target key end

     0   :  { %s592_s15 = smov 0   ;;  %s594_s16 = smov 0   ;;  %s691_s0 = inlined_call_operand.vmem [shape: f32[80,128], index: 0, kind: input, shape index: {}]   ;;  %s692_s1 = inlined_call_operand.vmem [shape: f32[128,128], index: 1, kind: input, shape index: {}]   ;;  %s693_s2 = inlined_call_operand.vmem [shape: f32[80,128], index: 2, kind: output, shape index: {0}]   ;;  %s694_s3 = inlined_call_operand.vmem [shape: f32[16,128], index: 3, kind: output, shape index: {1}]   ;;  %s695_s4 = inlined_call_operand.vmem [shape: f32[16,128], index: 4, kind: output, shape index: {2}]  }
   0x1   :  { %s596_s17 = smov 0  }
   0x2 LB: > { %s27_s18 = sadd.s32 1, %s561_s16  ;;  %p463_p0 = scmp.ge.s32.totalorder %s565_s17, 1  ;;  %s565_s17 = sphi %s596_s17, %s15_s17   ;;  %s561_s16 = sphi %s594_s16, %s697_s16   ;;  %s557_s15 = sphi %s592_s15, %s696_s15  }
   0x3   : > { %p29_p1 = scmp.ge.s32.totalorder %s27_s18, 2  ;;  %p186_p2 = scmp.lt.s32.totalorder %s565_s17, 3 }
   0x5   : > { %s699_s18 = smov (%p29_p1, %s27_s18), 0  ;;  %p187_p3 = pnand %p463_p0, %p186_p2 }
   0x6   : > { %s223_s7 = smul.u32 (!%p187_p3), 5, %s557_s15  ;;  %p238_p5 = scmp.lt.s32.totalorder (!%p187_p3), %s557_s15, 1 }
   0x7   : > { %190 = sbr.rel (%p187_p3) target bundleno = 189 (0xbd), region = 28 }
   0x8   : > { %p224_p4 = scmp.lt.s32.totalorder (!%p187_p3), %s223_s7, 9 }
   0xc   : > { %v272_v0 = vld [vmem:[%s692_s1 + $0x78] sm:$0xff]  ;;  %v271_v1 = vld [vmem:[%s692_s1 + $0x70] sm:$0xff]  ;;  %v270_v2 = vld [vmem:[%s692_s1 + $0x68] sm:$0xff]  ;;  %s701_s7 = smov (!%p224_p4, %s223_s7), 9  ;;  %s703_s15 = smov (!%p238_p5, %s557_s15), 1 }
   0xd   : > { %471 = vmatpush.msra.mxu2 %v272_v0  ;;  %472 = vmatpush.msra.mxu3 %v272_v0  ;;  %v269_v3 = vld [vmem:[%s692_s1 + $0x60] sm:$0xff]  ;;  %v268_v4 = vld [vmem:[%s692_s1 + $0x58] sm:$0xff]  ;;  %v267_v5 = vld [vmem:[%s692_s1 + $0x50] sm:$0xff]  ;;  %s464_s24 = sshll.u32 %s701_s7, 3  ;;  %s466_s7 = sshll.u32 %s703_s15, 3 }
   0xe   : > { %273 = vmatpush.msra.mxu0 %v272_v0  ;;  %470 = vmatpush.msra.mxu1 %v272_v0  ;;  %v266_v6 = vld [vmem:[%s692_s1 + $0x48] sm:$0xff]  ;;  %v265_v7 = vld [vmem:[%s692_s1 + $0x40] sm:$0xff]  ;;  %v264_v8 = vld [vmem:[%s692_s1 + $0x38] sm:$0xff]  ;;  %s227_s5 = scalar_lea.vmem %s691_s0, %s464_s24  ;;  %s235_s11 = scalar_lea.vmem %s693_s2, %s464_s24 }
   0xf   : > { %474 = vmatpush.msra.mxu2 %v271_v1  ;;  %475 = vmatpush.msra.mxu3 %v271_v1  ;;  %v263_v9 = vld [vmem:[%s692_s1 + $0x30] sm:$0xff]  ;;  %v262_v10 = vld [vmem:[%s692_s1 + $0x28] sm:$0xff]  ;;  %v261_v11 = vld [vmem:[%s692_s1 + $0x20] sm:$0xff]  ;;  %s241_s14 = scalar_lea.vmem %s694_s3, %s466_s7  ;;  %s245_s21 = scalar_lea.vmem %s695_s4, %s466_s7 }
  0x10   : > { %274 = vmatpush.msra.mxu0 %v271_v1  ;;  %473 = vmatpush.msra.mxu1 %v271_v1  ;;  %v260_v12 = vld [vmem:[%s692_s1 + $0x18] sm:$0xff]  ;;  %v259_v13 = vld [vmem:[%s692_s1 + $0x10] sm:$0xff]  ;;  %v258_v14 = vld [vmem:[%s692_s1 + $0x8] sm:$0xff] }
  0x11   : > { %477 = vmatpush.msra.mxu2 %v270_v2  ;;  %478 = vmatpush.msra.mxu3 %v270_v2  ;;  %v257_v15 = vld [vmem:[%s692_s1] sm:$0xff]  ;;  %v254_v16 = vld [vmem:[%s227_s5 + $0x10] sm:$0xff]  ;;  %v255_v17 = vld [vmem:[%s227_s5 + $0x18] sm:$0xff] }
  0x12   : > { %275 = vmatpush.msra.mxu0 %v270_v2  ;;  %476 = vmatpush.msra.mxu1 %v270_v2  ;;  %v252_v18 = vld [vmem:[%s227_s5] sm:$0xff]  ;;  %v253_v19 = vld [vmem:[%s227_s5 + $0x8] sm:$0xff] }
  0x13   : > { %480 = vmatpush.msra.mxu2 %v269_v3  ;;  %481 = vmatpush.msra.mxu3 %v269_v3  ;;  %v256_v20 = vld [vmem:[%s227_s5 + $0x20] sm:$0xff] }
  0x14   : > { %276 = vmatpush.msra.mxu0 %v269_v3  ;;  %479 = vmatpush.msra.mxu1 %v269_v3 }
  0x15   : > { %483 = vmatpush.msra.mxu2 %v268_v4  ;;  %484 = vmatpush.msra.mxu3 %v268_v4 }
  0x16   : > { %277 = vmatpush.msra.mxu0 %v268_v4  ;;  %482 = vmatpush.msra.mxu1 %v268_v4 }
  0x17   : > { %486 = vmatpush.msra.mxu2 %v267_v5  ;;  %487 = vmatpush.msra.mxu3 %v267_v5 }
  0x18   : > { %278 = vmatpush.msra.mxu0 %v267_v5  ;;  %485 = vmatpush.msra.mxu1 %v267_v5 }
  0x19   : > { %489 = vmatpush.msra.mxu2 %v266_v6  ;;  %490 = vmatpush.msra.mxu3 %v266_v6 }
  0x1a   : > { %279 = vmatpush.msra.mxu0 %v266_v6  ;;  %488 = vmatpush.msra.mxu1 %v266_v6 }
  0x1b   : > { %492 = vmatpush.msra.mxu2 %v265_v7  ;;  %493 = vmatpush.msra.mxu3 %v265_v7 }
  0x1c   : > { %280 = vmatpush.msra.mxu0 %v265_v7  ;;  %491 = vmatpush.msra.mxu1 %v265_v7 }
  0x1d   : > { %495 = vmatpush.msra.mxu2 %v264_v8  ;;  %496 = vmatpush.msra.mxu3 %v264_v8 }
  0x1e   : > { %281 = vmatpush.msra.mxu0 %v264_v8  ;;  %494 = vmatpush.msra.mxu1 %v264_v8 }
  0x1f   : > { %498 = vmatpush.msra.mxu2 %v263_v9  ;;  %499 = vmatpush.msra.mxu3 %v263_v9 }
  0x20   : > { %282 = vmatpush.msra.mxu0 %v263_v9  ;;  %497 = vmatpush.msra.mxu1 %v263_v9 }
  0x21   : > { %501 = vmatpush.msra.mxu2 %v262_v10  ;;  %502 = vmatpush.msra.mxu3 %v262_v10 }
  0x22   : > { %283 = vmatpush.msra.mxu0 %v262_v10  ;;  %500 = vmatpush.msra.mxu1 %v262_v10 }
  0x23   : > { %504 = vmatpush.msra.mxu2 %v261_v11  ;;  %505 = vmatpush.msra.mxu3 %v261_v11 }
  0x24   : > { %284 = vmatpush.msra.mxu0 %v261_v11  ;;  %503 = vmatpush.msra.mxu1 %v261_v11 }
  0x25   : > { %507 = vmatpush.msra.mxu2 %v260_v12  ;;  %508 = vmatpush.msra.mxu3 %v260_v12 }
  0x26   : > { %285 = vmatpush.msra.mxu0 %v260_v12  ;;  %506 = vmatpush.msra.mxu1 %v260_v12 }
  0x27   : > { %510 = vmatpush.msra.mxu2 %v259_v13  ;;  %511 = vmatpush.msra.mxu3 %v259_v13 }
  0x28   : > { %286 = vmatpush.msra.mxu0 %v259_v13  ;;  %509 = vmatpush.msra.mxu1 %v259_v13 }
  0x29   : > { %513 = vmatpush.msra.mxu2 %v258_v14  ;;  %514 = vmatpush.msra.mxu3 %v258_v14 }
  0x2a   : > { %287 = vmatpush.msra.mxu0 %v258_v14  ;;  %512 = vmatpush.msra.mxu1 %v258_v14 }
  0x2b   : > { %516 = vmatpush.msra.mxu2 %v257_v15  ;;  %517 = vmatpush.msra.mxu3 %v257_v15 }
  0x2c   : > { %295 = vmatmul.f32.vlgmr.msra.gmra.mxu2 %v254_v16  ;;  %298 = vmatmul.f32.vlgmr.msra.gmra.mxu3 %v255_v17 }
  0x2d   : > { %288 = vmatpush.msra.mxu0 %v257_v15  ;;  %515 = vmatpush.msra.mxu1 %v257_v15 }
  0x2e   : > { %289 = vmatmul.f32.vlgmr.msra.gmra.mxu0 %v252_v18  ;;  %292 = vmatmul.f32.vlgmr.msra.gmra.mxu1 %v253_v19 }
  0x34   : > { %301 = vmatmul.f32.gmra.mxu3 %v256_v20 }
  0xab   : > { %v290_v21 = vpop.f32.mrf.mxu0  ;;  %v293_v22 = vpop.f32.mrf.mxu1 }
  0xac   : > { %305 = vst [vmem:[%s235_s11] sm:$0xff] %v290_v21  ;;  %v318_v23 = vmul.f32 %v290_v21, %v290_v21  ;;  %v319_v24 = vmul.f32 %v293_v22, %v293_v22  ;;  %v311_v25 = vadd.f32 %v293_v22, %v290_v21 }
  0xad   : > { %306 = vst [vmem:[%s235_s11 + $0x8] sm:$0xff] %v293_v22 }
  0xae   : > { %v323_v28 = vadd.f32 %v319_v24, %v318_v23 }
  0xaf   : > { %v296_v26 = vpop.f32.mrf.mxu2  ;;  %v299_v27 = vpop.f32.mrf.mxu3 }
  0xb0   : > { %307 = vst [vmem:[%s235_s11 + $0x10] sm:$0xff] %v296_v26  ;;  %v320_v29 = vmul.f32 %v296_v26, %v296_v26  ;;  %v312_v30 = vadd.f32 %v311_v25, %v296_v26  ;;  %v321_v33 = vmul.f32 %v299_v27, %v299_v27 }
  0xb1   : > { %308 = vst [vmem:[%s235_s11 + $0x18] sm:$0xff] %v299_v27 }
  0xb2   : > { %v324_v31 = vadd.f32 %v323_v28, %v320_v29  ;;  %v313_v32 = vadd.f32 %v312_v30, %v299_v27 }
  0xb4   : > { %v325_v35 = vadd.f32 %v324_v31, %v321_v33 }
  0xb7   : > { %v302_v34 = vpop.f32.mrf.mxu3 }
  0xb8   : > { %309 = vst [vmem:[%s235_s11 + $0x20] sm:$0xff] %v302_v34  ;;  %v314_v36 = vadd.f32 %v313_v32, %v302_v34  ;;  %v322_v37 = vmul.f32 %v302_v34, %v302_v34 }
  0xba   : > { %v326_v38 = vadd.f32 %v325_v35, %v322_v37  ;;  %316 = vst [vmem:[%s241_s14] sm:$0xff] %v314_v36 }
  0xbc   : > { %328 = vst [vmem:[%s245_s21] sm:$0xff] %v326_v38 }
  0xbd PF: > { %s15_s17 = sadd.s32 1, %s565_s17   ;;  %s696_s15 = smov %s561_s16 }
  0xbe   : > { %p12_p6 = scmp.ge.s32.totalorder %s15_s17, 4   ;;  %s697_s16 = smov %s699_s18 }
  0xc0   :  { %14 = sbr.rel (!%p12_p6) target bundleno = 2 (0x2), region = 86 }

// kernel: causal_trans_conv_block.3
= control target key start
LH: loop header
LB: loop body
LE: loop exit
PB: predicated region body
PF: predicated region fallthrough
CT: control target
= control target key end

     0   :  { %s309_s9 = smov 0   ;;  %s339_s0 = inlined_call_operand.vmem [shape: f32[80,128], index: 0, kind: input, shape index: {}]   ;;  %s340_s1 = inlined_call_operand.vmem [shape: f32[2,128], index: 1, kind: input, shape index: {}]   ;;  %s341_s2 = inlined_call_operand.vmem [shape: f32[80,128], index: 2, kind: output, shape index: {}]  }
   0x1 LB: > { %s252_s10 = sadd.s32 4294967295, %s292_s9   ;;  %p256_p0 = scmp.ge.s32.totalorder %s292_s9, 1  ;;  %s292_s9 = sphi %s309_s9, %s12_s9  }
   0x2   : > { %p113_p1 = scmp.lt.s32.totalorder %s292_s9, 3 }
   0x4   : > { %p114_p2 = pnand %p256_p0, %p113_p1 }
   0x5   : > { %s135_s11 = smul.u32 (!%p114_p2), 5, %s252_s10 }
   0x6   : > { %117 = sbr.rel (%p114_p2) target bundleno = 36 (0x24), region = 28 }
   0x7   : > { %p136_p3 = scmp.lt.s32.totalorder (!%p114_p2), %s135_s11, 9 }
   0xb   : > { %s343_s11 = smov (!%p136_p3, %s135_s11), 9  ;;  %v274_v0 = vld [vmem:[%s340_s1] ss:$0 sm:$0xff]  ;;  %v275_v1 = vld [vmem:[%s340_s1 + $0x1] ss:$0 sm:$0xff] }
   0xc   : > { %s257_s14 = sshll.u32 %s343_s11, 3 }
   0xd   : > { %s139_s17 = scalar_lea.vmem %s339_s0, %s257_s14  ;;  %s145_s22 = scalar_lea.vmem %s341_s2, %s257_s14 }
   0xe   : > { %v147_v2 = vld [vmem:[%s139_s17] sm:$0xff]  ;;  %v148_v3 = vld [vmem:[%s139_s17 + $0x8] sm:$0xff]  ;;  %v149_v4 = vld [vmem:[%s139_s17 + $0x10] sm:$0xff] }
   0xf   : > { %v154_v5 = vmul.f32 %v274_v0, %v147_v2  ;;  %v155_v6 = vmul.f32 %v274_v0, %v148_v3  ;;  %v156_v7 = vmul.f32 %v274_v0, %v149_v4  ;;  %v150_v8 = vld [vmem:[%s139_s17 + $0x18] sm:$0xff]  ;;  %v151_v9 = vld [vmem:[%s139_s17 + $0x20] sm:$0xff] }
  0x10   : > { %v157_v10 = vmul.f32 %v274_v0, %v150_v8  ;;  %v158_v11 = vmul.f32 %v274_v0, %v151_v9 }
  0x11   : > { %v161_v12 = vadd.f32 %v275_v1, %v154_v5  ;;  %v162_v13 = vadd.f32 %v275_v1, %v155_v6  ;;  %v163_v14 = vadd.f32 %v275_v1, %v156_v7 }
  0x12   : > { %v164_v15 = vadd.f32 %v275_v1, %v157_v10  ;;  %v165_v16 = vadd.f32 %v275_v1, %v158_v11 }
  0x13   : > { %v171_v17 = vmul.f32 1.442695, %v161_v12  ;;  %v173_v18 = vmul.f32 1.442695, %v162_v13  ;;  %v175_v19 = vmul.f32 1.442695, %v163_v14 }
  0x14   : > { %v177_v20 = vmul.f32 1.442695, %v164_v15  ;;  %v179_v21 = vmul.f32 1.442695, %v165_v16  ;;  %vm166_vm0 = vcmp.gt.f32.partialorder %v161_v12, 0.0  ;;  %vm167_vm1 = vcmp.gt.f32.partialorder %v162_v13, 0.0 }
  0x15   : > { %276 = vpow2.f32 %v171_v17  ;;  %vm168_vm2 = vcmp.gt.f32.partialorder %v163_v14, 0.0  ;;  %vm169_vm3 = vcmp.gt.f32.partialorder %v164_v15, 0.0  ;;  %vm170_vm4 = vcmp.gt.f32.partialorder %v165_v16, 0.0 }
  0x16   : > { %278 = vpow2.f32 %v173_v18 }
  0x17   : > { %280 = vpow2.f32 %v175_v19 }
  0x18   : > { %282 = vpow2.f32 %v177_v20 }
  0x19   : > { %284 = vpow2.f32 %v179_v21 }
  0x1b   : > { %v277_v22 = vpop.eup %276 }
  0x1c   : > { %v279_v23 = vpop.eup %278  ;;  %v259_v24 = vadd.f32 -1.0, %v277_v22 }
  0x1d   : > { %v281_v25 = vpop.eup %280  ;;  %v260_v26 = vadd.f32 -1.0, %v279_v23 }
  0x1e   : > { %v283_v27 = vpop.eup %282  ;;  %v186_v28 = vsel %vm166_vm0, %v161_v12, %v259_v24  ;;  %v261_v29 = vadd.f32 -1.0, %v281_v25 }
  0x1f   : > { %v285_v30 = vpop.eup %284  ;;  %191 = vst [vmem:[%s145_s22] sm:$0xff] %v186_v28  ;;  %v187_v31 = vsel %vm167_vm1, %v162_v13, %v260_v26  ;;  %v262_v32 = vadd.f32 -1.0, %v283_v27 }
  0x20   : > { %192 = vst [vmem:[%s145_s22 + $0x8] sm:$0xff] %v187_v31  ;;  %v188_v33 = vsel %vm168_vm2, %v163_v14, %v261_v29  ;;  %v263_v34 = vadd.f32 -1.0, %v285_v30 }
  0x21   : > { %193 = vst [vmem:[%s145_s22 + $0x10] sm:$0xff] %v188_v33  ;;  %v189_v35 = vsel %vm169_vm3, %v164_v15, %v262_v32 }
  0x22   : > { %194 = vst [vmem:[%s145_s22 + $0x18] sm:$0xff] %v189_v35  ;;  %v190_v36 = vsel %vm170_vm4, %v165_v16, %v263_v34 }
  0x23   : > { %195 = vst [vmem:[%s145_s22 + $0x20] sm:$0xff] %v190_v36 }
  0x24 PF: > { %s12_s9 = sadd.s32 1, %s292_s9  }
  0x25   : > { %p9_p4 = scmp.ge.s32.totalorder %s12_s9, 4  }
  0x27   :  { %11 = sbr.rel (!%p9_p4) target bundleno = 1 (0x1), region = 58 }

</bundles_post_ra>
